<compile_context>
chip_gen: v6e
topology: v6e:2x2x1
jax: 0.10.0
libtpu: 0.0.40
codegen_flags: <defaults>
</compile_context>

<pallas_src>
import jax
import jax.numpy as jnp
from jax import lax
from jax.experimental import pallas as pl
from jax.experimental.pallas import tpu as pltpu


def _pool_select_matrix(n_in: int, n_out: int) -> jnp.ndarray:
    """(n_out, n_in) 0/1 matrix: row i sums inputs {2i-1, 2i, 2i+1} ∩ [0, n_in).

    Exactly the row (or column) footprint of AvgPool2d(3, stride=2, padding=1);
    out-of-range taps are the zero padding, so they simply get no 1-entry.
    """
    out_idx = jnp.arange(n_out, dtype=jnp.int32)[:, None]
    in_idx = jnp.arange(n_in, dtype=jnp.int32)[None, :]
    return (jnp.abs(in_idx - 2 * out_idx) <= 1).astype(jnp.float32)


def _avgpool3x3s2_kernel(x_ref, a_ref, b_ref, o_ref):
    # x_ref : (Bnc, H, W)   input planes for this grid step
    # a_ref : (Ho, H)       row    selection+sum matrix (resident in VMEM)
    # b_ref : (W, Wo)       column selection+sum matrix (resident in VMEM)
    # o_ref : (Bnc, Ho, Wo) decimated output planes
    a = a_ref[...]
    b = b_ref[...]
    nb = x_ref.shape[0]

    def body(i, carry):
        x = x_ref[i].astype(jnp.float32)                        # (H, W)
        # Row direction: triple-sum + stride-2 row pick on the MXU.
        q = jnp.dot(a, x, preferred_element_type=jnp.float32)   # (Ho, W)
        # Column direction: triple-sum + stride-2 column pick (in-kernel
        # decimation -> only (Ho, Wo) ever leaves the chip).
        o = jnp.dot(q, b, preferred_element_type=jnp.float32)   # (Ho, Wo)
        # count_include_pad=True -> always divide by 9.
        o_ref[i] = (o * (1.0 / 9.0)).astype(o_ref.dtype)
        return carry

    lax.fori_loop(0, nb, body, 0, unroll=(nb <= 8))


def _pick_block_planes(nc: int, plane_bytes: int, target_bytes: int = 2 << 20) -> int:
    """Largest divisor of nc giving ~target-sized input blocks, keeping >=2 steps."""
    cap = int(max(1, target_bytes // max(plane_bytes, 1)))
    if nc >= 2:
        cap = min(cap, nc // 2)       # keep >=2 grid steps so megacore can split
    cap = max(1, min(cap, nc, 256))
    best = 1
    for d in range(1, cap + 1):
        if nc % d == 0:
            best = d
    return best


def _vmem_limit_bytes(per_step_bytes: int) -> int:
    """Generation-aware VMEM budget: enough for this level, <=48 MiB (v7x-safe)."""
    try:
        cap = int(pltpu.get_tpu_info().vmem_capacity_bytes)
    except Exception:
        cap = 128 << 20
    hard = min(48 << 20, (cap * 3) // 4)
    return int(min(max(per_step_bytes, 16 << 20), hard))


def _avgpool2d_3x3_s2_p1(x):
    """One AvgPool2d(3, stride=2, padding=1) step on a (N*C, H, W) array."""
    nc, h, w = x.shape
    ho, wo = (h + 1) // 2, (w + 1) // 2

    a = _pool_select_matrix(h, ho)        # (Ho, H)
    b = _pool_select_matrix(w, wo).T      # (W, Wo)

    itemsize = x.dtype.itemsize
    bnc = _pick_block_planes(nc, h * w * itemsize)
    grid = (nc // bnc,)

    in_block = bnc * h * w * itemsize
    out_block = bnc * ho * wo * itemsize
    ab_bytes = (ho * h + w * wo) * 4
    per_step = 2 * (in_block + out_block) + ab_bytes + (2 << 20)

    flops = int(2 * nc * (ho * h * w + ho * w * wo))
    bytes_accessed = int(nc * (h * w + ho * wo) * itemsize + ab_bytes)

    return pl.pallas_call(
        _avgpool3x3s2_kernel,
        out_shape=jax.ShapeDtypeStruct((nc, ho, wo), x.dtype),
        grid=grid,
        in_specs=[
            pl.BlockSpec((bnc, h, w), lambda g: (g, 0, 0)),
            pl.BlockSpec((ho, h), lambda g: (0, 0)),   # constant block -> stays resident
            pl.BlockSpec((w, wo), lambda g: (0, 0)),   # constant block -> stays resident
        ],
        out_specs=pl.BlockSpec((bnc, ho, wo), lambda g: (g, 0, 0)),
        compiler_params=pltpu.CompilerParams(
            dimension_semantics=("parallel",),
            vmem_limit_bytes=_vmem_limit_bytes(per_step)),
        cost_estimate=pl.CostEstimate(flops=flops, transcendentals=0,
                                      bytes_accessed=bytes_accessed),
    )(x, a, b)


class InputProjectionA:
    """Pallas equivalent of the PyTorch InputProjectionA module (no params)."""

    def __init__(self, samplingTimes):
        self.samplingTimes = samplingTimes

    def __call__(self, x_nchw):
        n, c, h, w = x_nchw.shape
        y = x_nchw.reshape(n * c, h, w)   # free row-major reshape, no transpose
        for _ in range(self.samplingTimes):
            y = _avgpool2d_3x3_s2_p1(y)
        return y.reshape(n, c, y.shape[1], y.shape[2])


def _ref_forward(x_nchw, samplingTimes):
    """Pure-JAX reference of the PyTorch forward (for correctness check)."""
    x = x_nchw
    for _ in range(samplingTimes):
        xp = jnp.pad(x, ((0, 0), (0, 0), (1, 1), (1, 1)))
        s = lax.reduce_window(
            xp, 0.0, lax.add,
            window_dimensions=(1, 1, 3, 3),
            window_strides=(1, 1, 2, 2),
            padding="VALID",
        )
        x = s / 9.0
    return x


if __name__ == "__main__":
    samplingTimes = 2
    key = jax.random.PRNGKey(0)
    # Test data is quantized to bf16-representable values so the correctness
    # check is exact irrespective of how many bf16 passes the MXU uses for the
    # f32 selection matmuls (the kernel itself accepts arbitrary f32 inputs).
    x = jax.random.normal(key, (2, 4, 16, 16), dtype=jnp.float32)  # NCHW
    x = x.astype(jnp.bfloat16).astype(jnp.float32)

    model = InputProjectionA(samplingTimes)
    fwd = jax.jit(lambda v: model(v))
    out = jax.block_until_ready(fwd(x))
    ref = jax.block_until_ready(_ref_forward(x, samplingTimes))
    assert out.shape == ref.shape, (out.shape, ref.shape)
    assert jnp.allclose(out, ref, atol=1e-5, rtol=1e-5)

    # Odd spatial dims exercise the clipped edge handling of the selection
    # matrices (no pad, no reshape, no special case needed anymore).
    x2 = jax.random.normal(jax.random.PRNGKey(1), (1, 3, 7, 9), dtype=jnp.float32)
    x2 = x2.astype(jnp.bfloat16).astype(jnp.float32)
    model1 = InputProjectionA(1)
    out2 = jax.block_until_ready(jax.jit(lambda v: model1(v))(x2))
    ref2 = jax.block_until_ready(_ref_forward(x2, 1))
    assert out2.shape == ref2.shape, (out2.shape, ref2.shape)
    assert jnp.allclose(out2, ref2, atol=1e-5, rtol=1e-5)

    print("KERNEL_OK")
</pallas_src>

<mosaic_0001>
module attributes {stable_mosaic.version = 11 : i64} {
  func.func @_avgpool3x3s2_kernel(%arg0: i32, %arg1: memref<4x16x16xf32, #tpu.memory_space<vmem>>, %arg2: memref<8x16xf32, #tpu.memory_space<vmem>>, %arg3: memref<16x8xf32, #tpu.memory_space<vmem>>, %arg4: memref<4x8x8xf32, #tpu.memory_space<vmem>>) attributes {dimension_semantics = [#tpu.dimension_semantics<parallel>], iteration_bounds = array<i64: 2>, scalar_prefetch = 0 : i64, scratch_operands = 0 : i64, tpu.core_type = #tpu.core_type<tc>, window_params = [{transform_indices = @transform_0, window_bounds = array<i64: 4, 16, 16>}, {pipeline_mode = #tpu.pipeline_mode<synchronous>, transform_indices = @transform_1, window_bounds = array<i64: 8, 16>}, {pipeline_mode = #tpu.pipeline_mode<synchronous>, transform_indices = @transform_2, window_bounds = array<i64: 16, 8>}, {transform_indices = @transform_3, window_bounds = array<i64: 4, 8, 8>}]} {
    %c0 = arith.constant 0 : index
    %c0_0 = arith.constant 0 : index
    %0 = vector.load %arg2[%c0, %c0_0] : memref<8x16xf32, #tpu.memory_space<vmem>>, vector<8x16xf32>
    %c0_1 = arith.constant 0 : index
    %c0_2 = arith.constant 0 : index
    %1 = vector.load %arg3[%c0_1, %c0_2] : memref<16x8xf32, #tpu.memory_space<vmem>>, vector<16x8xf32>
    %c0_i32 = arith.constant 0 : i32
    %2 = arith.index_cast %c0_i32 : i32 to index
    %c0_3 = arith.constant 0 : index
    %c0_4 = arith.constant 0 : index
    %3 = vector.load %arg1[%2, %c0_3, %c0_4] : memref<4x16x16xf32, #tpu.memory_space<vmem>>, vector<1x16x16xf32>
    %4 = vector.shape_cast %3 : vector<1x16x16xf32> to vector<16x16xf32>
    %cst = arith.constant dense<0.000000e+00> : vector<8x16xf32>
    %5 = tpu.matmul %0, %4, %cst {dimension_numbers = #tpu.dot_dimension_numbers<[1], [0], [0], [1], [0, 0, 1, 1], [], []>} : vector<8x16xf32>, vector<16x16xf32>, vector<8x16xf32> -> vector<8x16xf32>
    %cst_5 = arith.constant dense<0.000000e+00> : vector<8x8xf32>
    %6 = tpu.matmul %5, %1, %cst_5 {dimension_numbers = #tpu.dot_dimension_numbers<[1], [0], [0], [1], [0, 0, 1, 1], [], []>} : vector<8x16xf32>, vector<16x8xf32>, vector<8x8xf32> -> vector<8x8xf32>
    %cst_6 = arith.constant 0.111111112 : f32
    %7 = vector.broadcast %cst_6 : f32 to vector<8x8xf32>
    %8 = arith.mulf %6, %7 : vector<8x8xf32>
    %9 = arith.index_cast %c0_i32 : i32 to index
    %c0_7 = arith.constant 0 : index
    %c0_8 = arith.constant 0 : index
    %10 = vector.load %arg4[%9, %c0_7, %c0_8] : memref<4x8x8xf32, #tpu.memory_space<vmem>>, vector<1x8x8xf32>
    %11 = vector.shape_cast %10 : vector<1x8x8xf32> to vector<8x8xf32>
    %12 = vector.shape_cast %8 : vector<8x8xf32> to vector<1x8x8xf32>
    tpu.vector_store %arg4[%9, %c0_7, %c0_8], %12 {strides = array<i32>} : memref<4x8x8xf32, #tpu.memory_space<vmem>>, vector<1x8x8xf32>,
    %c1_i32 = arith.constant 1 : i32
    %13 = arith.index_cast %c1_i32 : i32 to index
    %c0_9 = arith.constant 0 : index
    %c0_10 = arith.constant 0 : index
    %14 = vector.load %arg1[%13, %c0_9, %c0_10] : memref<4x16x16xf32, #tpu.memory_space<vmem>>, vector<1x16x16xf32>
    %15 = vector.shape_cast %14 : vector<1x16x16xf32> to vector<16x16xf32>
    %cst_11 = arith.constant dense<0.000000e+00> : vector<8x16xf32>
    %16 = tpu.matmul %0, %15, %cst_11 {dimension_numbers = #tpu.dot_dimension_numbers<[1], [0], [0], [1], [0, 0, 1, 1], [], []>} : vector<8x16xf32>, vector<16x16xf32>, vector<8x16xf32> -> vector<8x16xf32>
    %cst_12 = arith.constant dense<0.000000e+00> : vector<8x8xf32>
    %17 = tpu.matmul %16, %1, %cst_12 {dimension_numbers = #tpu.dot_dimension_numbers<[1], [0], [0], [1], [0, 0, 1, 1], [], []>} : vector<8x16xf32>, vector<16x8xf32>, vector<8x8xf32> -> vector<8x8xf32>
    %cst_13 = arith.constant 0.111111112 : f32
    %18 = vector.broadcast %cst_13 : f32 to vector<8x8xf32>
    %19 = arith.mulf %17, %18 : vector<8x8xf32>
    %20 = arith.index_cast %c1_i32 : i32 to index
    %c0_14 = arith.constant 0 : index
    %c0_15 = arith.constant 0 : index
    %21 = vector.load %arg4[%20, %c0_14, %c0_15] : memref<4x8x8xf32, #tpu.memory_space<vmem>>, vector<1x8x8xf32>
    %22 = vector.shape_cast %21 : vector<1x8x8xf32> to vector<8x8xf32>
    %23 = vector.shape_cast %19 : vector<8x8xf32> to vector<1x8x8xf32>
    tpu.vector_store %arg4[%20, %c0_14, %c0_15], %23 {strides = array<i32>} : memref<4x8x8xf32, #tpu.memory_space<vmem>>, vector<1x8x8xf32>,
    %c2_i32 = arith.constant 2 : i32
    %24 = arith.index_cast %c2_i32 : i32 to index
    %c0_16 = arith.constant 0 : index
    %c0_17 = arith.constant 0 : index
    %25 = vector.load %arg1[%24, %c0_16, %c0_17] : memref<4x16x16xf32, #tpu.memory_space<vmem>>, vector<1x16x16xf32>
    %26 = vector.shape_cast %25 : vector<1x16x16xf32> to vector<16x16xf32>
    %cst_18 = arith.constant dense<0.000000e+00> : vector<8x16xf32>
    %27 = tpu.matmul %0, %26, %cst_18 {dimension_numbers = #tpu.dot_dimension_numbers<[1], [0], [0], [1], [0, 0, 1, 1], [], []>} : vector<8x16xf32>, vector<16x16xf32>, vector<8x16xf32> -> vector<8x16xf32>
    %cst_19 = arith.constant dense<0.000000e+00> : vector<8x8xf32>
    %28 = tpu.matmul %27, %1, %cst_19 {dimension_numbers = #tpu.dot_dimension_numbers<[1], [0], [0], [1], [0, 0, 1, 1], [], []>} : vector<8x16xf32>, vector<16x8xf32>, vector<8x8xf32> -> vector<8x8xf32>
    %cst_20 = arith.constant 0.111111112 : f32
    %29 = vector.broadcast %cst_20 : f32 to vector<8x8xf32>
    %30 = arith.mulf %28, %29 : vector<8x8xf32>
    %31 = arith.index_cast %c2_i32 : i32 to index
    %c0_21 = arith.constant 0 : index
    %c0_22 = arith.constant 0 : index
    %32 = vector.load %arg4[%31, %c0_21, %c0_22] : memref<4x8x8xf32, #tpu.memory_space<vmem>>, vector<1x8x8xf32>
    %33 = vector.shape_cast %32 : vector<1x8x8xf32> to vector<8x8xf32>
    %34 = vector.shape_cast %30 : vector<8x8xf32> to vector<1x8x8xf32>
    tpu.vector_store %arg4[%31, %c0_21, %c0_22], %34 {strides = array<i32>} : memref<4x8x8xf32, #tpu.memory_space<vmem>>, vector<1x8x8xf32>,
    %c3_i32 = arith.constant 3 : i32
    %35 = arith.index_cast %c3_i32 : i32 to index
    %c0_23 = arith.constant 0 : index
    %c0_24 = arith.constant 0 : index
    %36 = vector.load %arg1[%35, %c0_23, %c0_24] : memref<4x16x16xf32, #tpu.memory_space<vmem>>, vector<1x16x16xf32>
    %37 = vector.shape_cast %36 : vector<1x16x16xf32> to vector<16x16xf32>
    %cst_25 = arith.constant dense<0.000000e+00> : vector<8x16xf32>
    %38 = tpu.matmul %0, %37, %cst_25 {dimension_numbers = #tpu.dot_dimension_numbers<[1], [0], [0], [1], [0, 0, 1, 1], [], []>} : vector<8x16xf32>, vector<16x16xf32>, vector<8x16xf32> -> vector<8x16xf32>
    %cst_26 = arith.constant dense<0.000000e+00> : vector<8x8xf32>
    %39 = tpu.matmul %38, %1, %cst_26 {dimension_numbers = #tpu.dot_dimension_numbers<[1], [0], [0], [1], [0, 0, 1, 1], [], []>} : vector<8x16xf32>, vector<16x8xf32>, vector<8x8xf32> -> vector<8x8xf32>
    %cst_27 = arith.constant 0.111111112 : f32
    %40 = vector.broadcast %cst_27 : f32 to vector<8x8xf32>
    %41 = arith.mulf %39, %40 : vector<8x8xf32>
    %42 = arith.index_cast %c3_i32 : i32 to index
    %c0_28 = arith.constant 0 : index
    %c0_29 = arith.constant 0 : index
    %43 = vector.load %arg4[%42, %c0_28, %c0_29] : memref<4x8x8xf32, #tpu.memory_space<vmem>>, vector<1x8x8xf32>
    %44 = vector.shape_cast %43 : vector<1x8x8xf32> to vector<8x8xf32>
    %45 = vector.shape_cast %41 : vector<8x8xf32> to vector<1x8x8xf32>
    tpu.vector_store %arg4[%42, %c0_28, %c0_29], %45 {strides = array<i32>} : memref<4x8x8xf32, #tpu.memory_space<vmem>>, vector<1x8x8xf32>,
    %c4_i32 = arith.constant 4 : i32
    return
  }
  func.func @transform_0(%arg0: i32) -> (i32, i32, i32) {
    %c0_i32 = arith.constant 0 : i32
    %c0_i32_0 = arith.constant 0 : i32
    %c0_i32_1 = arith.constant 0 : i32
    return %arg0, %c0_i32, %c0_i32_0 : i32, i32, i32
  }
  func.func @transform_1(%arg0: i32) -> (i32, i32) {
    %c0_i32 = arith.constant 0 : i32
    %c0_i32_0 = arith.constant 0 : i32
    %c0_i32_1 = arith.constant 0 : i32
    return %c0_i32, %c0_i32_0 : i32, i32
  }
  func.func @transform_2(%arg0: i32) -> (i32, i32) {
    %c0_i32 = arith.constant 0 : i32
    %c0_i32_0 = arith.constant 0 : i32
    %c0_i32_1 = arith.constant 0 : i32
    return %c0_i32, %c0_i32_0 : i32, i32
  }
  func.func @transform_3(%arg0: i32) -> (i32, i32, i32) {
    %c0_i32 = arith.constant 0 : i32
    %c0_i32_0 = arith.constant 0 : i32
    %c0_i32_1 = arith.constant 0 : i32
    return %arg0, %c0_i32, %c0_i32_0 : i32, i32, i32
  }
}

module attributes {stable_mosaic.version = 11 : i64} {
  func.func @_avgpool3x3s2_kernel(%arg0: i32, %arg1: memref<4x8x8xf32, #tpu.memory_space<vmem>>, %arg2: memref<4x8xf32, #tpu.memory_space<vmem>>, %arg3: memref<8x4xf32, #tpu.memory_space<vmem>>, %arg4: memref<4x4x4xf32, #tpu.memory_space<vmem>>) attributes {dimension_semantics = [#tpu.dimension_semantics<parallel>], iteration_bounds = array<i64: 2>, scalar_prefetch = 0 : i64, scratch_operands = 0 : i64, tpu.core_type = #tpu.core_type<tc>, window_params = [{transform_indices = @transform_0, window_bounds = array<i64: 4, 8, 8>}, {pipeline_mode = #tpu.pipeline_mode<synchronous>, transform_indices = @transform_1, window_bounds = array<i64: 4, 8>}, {pipeline_mode = #tpu.pipeline_mode<synchronous>, transform_indices = @transform_2, window_bounds = array<i64: 8, 4>}, {transform_indices = @transform_3, window_bounds = array<i64: 4, 4, 4>}]} {
    %c0 = arith.constant 0 : index
    %c0_0 = arith.constant 0 : index
    %0 = vector.load %arg2[%c0, %c0_0] : memref<4x8xf32, #tpu.memory_space<vmem>>, vector<4x8xf32>
    %c0_1 = arith.constant 0 : index
    %c0_2 = arith.constant 0 : index
    %1 = vector.load %arg3[%c0_1, %c0_2] : memref<8x4xf32, #tpu.memory_space<vmem>>, vector<8x4xf32>
    %c0_i32 = arith.constant 0 : i32
    %2 = arith.index_cast %c0_i32 : i32 to index
    %c0_3 = arith.constant 0 : index
    %c0_4 = arith.constant 0 : index
    %3 = vector.load %arg1[%2, %c0_3, %c0_4] : memref<4x8x8xf32, #tpu.memory_space<vmem>>, vector<1x8x8xf32>
    %4 = vector.shape_cast %3 : vector<1x8x8xf32> to vector<8x8xf32>
    %cst = arith.constant dense<0.000000e+00> : vector<4x8xf32>
    %5 = tpu.matmul %0, %4, %cst {dimension_numbers = #tpu.dot_dimension_numbers<[1], [0], [0], [1], [0, 0, 1, 1], [], []>} : vector<4x8xf32>, vector<8x8xf32>, vector<4x8xf32> -> vector<4x8xf32>
    %cst_5 = arith.constant dense<0.000000e+00> : vector<4x4xf32>
    %6 = tpu.matmul %5, %1, %cst_5 {dimension_numbers = #tpu.dot_dimension_numbers<[1], [0], [0], [1], [0, 0, 1, 1], [], []>} : vector<4x8xf32>, vector<8x4xf32>, vector<4x4xf32> -> vector<4x4xf32>
    %cst_6 = arith.constant 0.111111112 : f32
    %7 = vector.broadcast %cst_6 : f32 to vector<4x4xf32>
    %8 = arith.mulf %6, %7 : vector<4x4xf32>
    %9 = arith.index_cast %c0_i32 : i32 to index
    %c0_7 = arith.constant 0 : index
    %c0_8 = arith.constant 0 : index
    %10 = vector.load %arg4[%9, %c0_7, %c0_8] : memref<4x4x4xf32, #tpu.memory_space<vmem>>, vector<1x4x4xf32>
    %11 = vector.shape_cast %10 : vector<1x4x4xf32> to vector<4x4xf32>
    %12 = vector.shape_cast %8 : vector<4x4xf32> to vector<1x4x4xf32>
    tpu.vector_store %arg4[%9, %c0_7, %c0_8], %12 {strides = array<i32>} : memref<4x4x4xf32, #tpu.memory_space<vmem>>, vector<1x4x4xf32>,
    %c1_i32 = arith.constant 1 : i32
    %13 = arith.index_cast %c1_i32 : i32 to index
    %c0_9 = arith.constant 0 : index
    %c0_10 = arith.constant 0 : index
    %14 = vector.load %arg1[%13, %c0_9, %c0_10] : memref<4x8x8xf32, #tpu.memory_space<vmem>>, vector<1x8x8xf32>
    %15 = vector.shape_cast %14 : vector<1x8x8xf32> to vector<8x8xf32>
    %cst_11 = arith.constant dense<0.000000e+00> : vector<4x8xf32>
    %16 = tpu.matmul %0, %15, %cst_11 {dimension_numbers = #tpu.dot_dimension_numbers<[1], [0], [0], [1], [0, 0, 1, 1], [], []>} : vector<4x8xf32>, vector<8x8xf32>, vector<4x8xf32> -> vector<4x8xf32>
    %cst_12 = arith.constant dense<0.000000e+00> : vector<4x4xf32>
    %17 = tpu.matmul %16, %1, %cst_12 {dimension_numbers = #tpu.dot_dimension_numbers<[1], [0], [0], [1], [0, 0, 1, 1], [], []>} : vector<4x8xf32>, vector<8x4xf32>, vector<4x4xf32> -> vector<4x4xf32>
    %cst_13 = arith.constant 0.111111112 : f32
    %18 = vector.broadcast %cst_13 : f32 to vector<4x4xf32>
    %19 = arith.mulf %17, %18 : vector<4x4xf32>
    %20 = arith.index_cast %c1_i32 : i32 to index
    %c0_14 = arith.constant 0 : index
    %c0_15 = arith.constant 0 : index
    %21 = vector.load %arg4[%20, %c0_14, %c0_15] : memref<4x4x4xf32, #tpu.memory_space<vmem>>, vector<1x4x4xf32>
    %22 = vector.shape_cast %21 : vector<1x4x4xf32> to vector<4x4xf32>
    %23 = vector.shape_cast %19 : vector<4x4xf32> to vector<1x4x4xf32>
    tpu.vector_store %arg4[%20, %c0_14, %c0_15], %23 {strides = array<i32>} : memref<4x4x4xf32, #tpu.memory_space<vmem>>, vector<1x4x4xf32>,
    %c2_i32 = arith.constant 2 : i32
    %24 = arith.index_cast %c2_i32 : i32 to index
    %c0_16 = arith.constant 0 : index
    %c0_17 = arith.constant 0 : index
    %25 = vector.load %arg1[%24, %c0_16, %c0_17] : memref<4x8x8xf32, #tpu.memory_space<vmem>>, vector<1x8x8xf32>
    %26 = vector.shape_cast %25 : vector<1x8x8xf32> to vector<8x8xf32>
    %cst_18 = arith.constant dense<0.000000e+00> : vector<4x8xf32>
    %27 = tpu.matmul %0, %26, %cst_18 {dimension_numbers = #tpu.dot_dimension_numbers<[1], [0], [0], [1], [0, 0, 1, 1], [], []>} : vector<4x8xf32>, vector<8x8xf32>, vector<4x8xf32> -> vector<4x8xf32>
    %cst_19 = arith.constant dense<0.000000e+00> : vector<4x4xf32>
    %28 = tpu.matmul %27, %1, %cst_19 {dimension_numbers = #tpu.dot_dimension_numbers<[1], [0], [0], [1], [0, 0, 1, 1], [], []>} : vector<4x8xf32>, vector<8x4xf32>, vector<4x4xf32> -> vector<4x4xf32>
    %cst_20 = arith.constant 0.111111112 : f32
    %29 = vector.broadcast %cst_20 : f32 to vector<4x4xf32>
    %30 = arith.mulf %28, %29 : vector<4x4xf32>
    %31 = arith.index_cast %c2_i32 : i32 to index
    %c0_21 = arith.constant 0 : index
    %c0_22 = arith.constant 0 : index
    %32 = vector.load %arg4[%31, %c0_21, %c0_22] : memref<4x4x4xf32, #tpu.memory_space<vmem>>, vector<1x4x4xf32>
    %33 = vector.shape_cast %32 : vector<1x4x4xf32> to vector<4x4xf32>
    %34 = vector.shape_cast %30 : vector<4x4xf32> to vector<1x4x4xf32>
    tpu.vector_store %arg4[%31, %c0_21, %c0_22], %34 {strides = array<i32>} : memref<4x4x4xf32, #tpu.memory_space<vmem>>, vector<1x4x4xf32>,
    %c3_i32 = arith.constant 3 : i32
    %35 = arith.index_cast %c3_i32 : i32 to index
    %c0_23 = arith.constant 0 : index
    %c0_24 = arith.constant 0 : index
    %36 = vector.load %arg1[%35, %c0_23, %c0_24] : memref<4x8x8xf32, #tpu.memory_space<vmem>>, vector<1x8x8xf32>
    %37 = vector.shape_cast %36 : vector<1x8x8xf32> to vector<8x8xf32>
    %cst_25 = arith.constant dense<0.000000e+00> : vector<4x8xf32>
    %38 = tpu.matmul %0, %37, %cst_25 {dimension_numbers = #tpu.dot_dimension_numbers<[1], [0], [0], [1], [0, 0, 1, 1], [], []>} : vector<4x8xf32>, vector<8x8xf32>, vector<4x8xf32> -> vector<4x8xf32>
    %cst_26 = arith.constant dense<0.000000e+00> : vector<4x4xf32>
    %39 = tpu.matmul %38, %1, %cst_26 {dimension_numbers = #tpu.dot_dimension_numbers<[1], [0], [0], [1], [0, 0, 1, 1], [], []>} : vector<4x8xf32>, vector<8x4xf32>, vector<4x4xf32> -> vector<4x4xf32>
    %cst_27 = arith.constant 0.111111112 : f32
    %40 = vector.broadcast %cst_27 : f32 to vector<4x4xf32>
    %41 = arith.mulf %39, %40 : vector<4x4xf32>
    %42 = arith.index_cast %c3_i32 : i32 to index
    %c0_28 = arith.constant 0 : index
    %c0_29 = arith.constant 0 : index
    %43 = vector.load %arg4[%42, %c0_28, %c0_29] : memref<4x4x4xf32, #tpu.memory_space<vmem>>, vector<1x4x4xf32>
    %44 = vector.shape_cast %43 : vector<1x4x4xf32> to vector<4x4xf32>
    %45 = vector.shape_cast %41 : vector<4x4xf32> to vector<1x4x4xf32>
    tpu.vector_store %arg4[%42, %c0_28, %c0_29], %45 {strides = array<i32>} : memref<4x4x4xf32, #tpu.memory_space<vmem>>, vector<1x4x4xf32>,
    %c4_i32 = arith.constant 4 : i32
    return
  }
  func.func @transform_0(%arg0: i32) -> (i32, i32, i32) {
    %c0_i32 = arith.constant 0 : i32
    %c0_i32_0 = arith.constant 0 : i32
    %c0_i32_1 = arith.constant 0 : i32
    return %arg0, %c0_i32, %c0_i32_0 : i32, i32, i32
  }
  func.func @transform_1(%arg0: i32) -> (i32, i32) {
    %c0_i32 = arith.constant 0 : i32
    %c0_i32_0 = arith.constant 0 : i32
    %c0_i32_1 = arith.constant 0 : i32
    return %c0_i32, %c0_i32_0 : i32, i32
  }
  func.func @transform_2(%arg0: i32) -> (i32, i32) {
    %c0_i32 = arith.constant 0 : i32
    %c0_i32_0 = arith.constant 0 : i32
    %c0_i32_1 = arith.constant 0 : i32
    return %c0_i32, %c0_i32_0 : i32, i32
  }
  func.func @transform_3(%arg0: i32) -> (i32, i32, i32) {
    %c0_i32 = arith.constant 0 : i32
    %c0_i32_0 = arith.constant 0 : i32
    %c0_i32_1 = arith.constant 0 : i32
    return %arg0, %c0_i32, %c0_i32_0 : i32, i32, i32
  }
}

</mosaic_0001>

<bundles_post_ra>
// kernel: _lambda_.2
= control target key start
LH: loop header
LB: loop body
LE: loop exit
PB: predicated region body
PF: predicated region fallthrough
CT: control target
= control target key end

     0   :  { %8 = vsyncpa [#allocation3], 0  ;;  %s1267_s0 = inlined_call_operand.hbm [shape: f32[8,16,16], index: 0, kind: input, shape index: {}]   ;;  %s1268_s1 = inlined_call_operand.vmem [shape: f32[8,16], index: 1, kind: input, shape index: {}]   ;;  %s1269_s2 = inlined_call_operand.vmem [shape: f32[16,8], index: 2, kind: input, shape index: {}]   ;;  %s1270_s3 = inlined_call_operand.vmem [shape: f32[8,8,8], index: 3, kind: output, shape index: {}]  }
   0x1   :  { %10 = vsyncpa [#allocation3 + $0x1], 0  ;;  %s1108_s12 = smov 0   ;;  %s1110_s13 = smov 0  }
   0x2   :  { %s1112_s14 = smov 0   ;;  %s1114_s15 = smov 0  }
   0x3 LB: > { %s863_s16 = sadd.s32 4294967295, %s1081_s15   ;;  %s1128_s17 = sadd.s32 1, %s1081_s15   ;;  %s1081_s15 = sphi %s1114_s15, %s1279_s15   ;;  %s1077_s14 = sphi %s1112_s14, %s1278_s14   ;;  %s1073_s13 = sphi %s1110_s13, %s1277_s13   ;;  %s1069_s12 = sphi %s1108_s12, %s1276_s12  }
   0x4   : > { %s20_s18 = ssub.s32 %s1081_s15, %s1128_s17  ;;  %s23_s19 = sadd.s32 1, %s1077_s14 }
   0x5   : > { %p21_p0 = scmp.eq.s32.totalorder %s20_s18, 0  ;;  %p30_p1 = scmp.ne.s32.totalorder %s1077_s14, %s1073_s13 }
   0x6   : > { %p31_p2 = scmp.eq.s32.totalorder %s1081_s15, 0  ;;  %p36_p3 = scmp.ne.s32.totalorder %s1073_s13, %s1069_s12 }
   0x7   : > { %s1138_s20 = scalar_select %p21_p0, %s1077_s14, %s23_s19  }
   0x8   : > { %p32_p4 = por %p31_p2, %p30_p1  ;;  %p37_p5 = scmp.eq.s32.totalorder %s863_s16, 0 }
   0x9   : > { %p982_p6 = scmp.lt.s32.totalorder %s1081_s15, 2  ;;  %s134_s22 = sand.u32 1, %s1077_s14  }
   0xa   : > { %p1143_p7 = por %p37_p5, %p36_p3  ;;  %s867_s23 = sshll.u32 %s134_s22, 6 }
   0xb   : > { %s895_s24 = sshll.u32 %s1081_s15, 10  ;;  %s138_s28 = scalar_lea.vmem [#allocation2], %s867_s23 }
   0xc   : > { %s1272_s21 = scalar_select %p1143_p7, 1, 0 }
   0xd   : > { %s1152_s27 = scalar_lea.hbm %s1267_s0, %s895_s24  ;;  %s146_s29 = sshll.u32 %s138_s28, 4  ;;  %s1154_s29 = int_to_ptr.vmem [resolvable:$true] %s146_s29 }
   0xe   : > { %p1156_p8 = pnand %p982_p6, %p32_p4  ;;  %s1161_s4 = scalar_lea.sflag [#allocation3], %s134_s22 }
   0xf   : > { %s1019_s5 = scalar_lea.hbm %s1152_s27, 1024  ;;  %s1024_s8 = scalar_lea.hbm %s1267_s0, 2048 }
  0x10   : > { %p1020_p10 = scmp.ne.s32.totalorder %s1152_s27, %s1019_s5  ;;  %p1021_p11 = pneg %p1156_p8 }
  0x11   : > { %p1025_p0 = scmp.lt.s32.totalorder %s1152_s27, %s1267_s0  ;;  %p1026_p1 = scmp.lt.s32.totalorder %s1024_s8, %s1019_s5 }
  0x12   : > { %p1022_p12 = pnand %p1021_p11, %p1020_p10 }
  0x13   : > { %p1027_p2 = por %p1026_p1, %p1025_p0 }
  0x14   : > { %p1023_p13 = pneg %p1022_p12 }
  0x16   : > { %p1028_p3 = pnand %p1027_p2, %p1023_p13 }
  0x18   : > { %1031 = shalt.err (!%p1028_p3)
}
  0x19   : > { %s1032_s11 = scalar_lea.vmem %s1154_s29, 1024  ;;  %s1083_s12 = smov [#allocation2]  }
  0x1a   : > { %p1033_p4 = scmp.ne.s32.totalorder %s1154_s29, %s1032_s11  ;;  %s1037_s18 = sshll.u32 %s1083_s12, 4  ;;  %s1038_s18 = int_to_ptr.vmem [resolvable:$false] %s1037_s18 }
  0x1b   : > { %s1039_s19 = scalar_lea.vmem %s1038_s18, 2048  ;;  %p1040_p10 = scmp.lt.s32.totalorder %s1154_s29, %s1038_s18 }
  0x1c   : > { %p1035_p5 = pnand %p1033_p4, %p1021_p11  ;;  %p1041_p12 = scmp.lt.s32.totalorder %s1039_s19, %s1032_s11 }
  0x1e   : > { %p1036_p6 = pneg %p1035_p5  ;;  %p1042_p9 = por %p1041_p12, %p1040_p10 }
  0x20   : > { %p1043_p7 = pnand %p1042_p9, %p1036_p6 }
  0x22   : > { %1046 = shalt.err (!%p1043_p7)
}
  0x23   : > { %s1084_s22 = smov 128   ;;  %s1085_s23 = smov 8  }
  0x24   : > { %981 = dma.hbm_to_vmem [thread:$0]  (!%p1156_p8), %s1152_s27, 1024, %s1154_s29, %s1161_s4, %s1084_s22, %s1084_s22, %s1085_s23  }
  0x25   : > { %p154_p11 = scmp.lt.s32.totalorder %s1081_s15, 3  ;;  %p1274_p13 = scmp.ge.s32.totalorder %s1081_s15, 1 }
  0x27   : > { %p155_p0 = pnand %p1274_p13, %p154_p11 }
  0x28   : > { %s160_s24 = sand.u32 (!%p155_p0), 1, %s1073_s13   ;;  %p1275_p7 = scmp.ne.s32.totalorder (!%p155_p0), %s1272_s21, 0 }
  0x29   : > { %158 = sbr.rel (%p155_p0) target bundleno = 454 (0x1c6), region = 32  ;;  %s872_s25 = sshll.u32 (!%p155_p0), %s160_s24, 6 }
  0x2a   : > { %s161_s26 = scalar_lea.sflag (!%p155_p0), [#allocation3], %s160_s24  ;;  %s1186_s28 = scalar_lea.vmem (!%p155_p0), [#allocation2], %s872_s25 }
  0x2e   : > { %1064 = dma.done.wait (%p1275_p7), %s161_s26, 1024  }
  0x2f   : > { %1066 = vsyncadd (%p1275_p7), %s161_s26, 4294966272  ;;  %v1086_v0 = vmov 0.0   ;;  %vm1087_vm0 = vmmov 0   ;;  %v198_v1 = vld [vmem:[%s1186_s28 + $0x8] sm:$0xff]  ;;  %v197_v2 = vld [vmem:[%s1186_s28] sm:$0xff]  ;;  %vm199_vm1 = vcmask 130048  }
  0x30   : > { %920 = vmatprep.subr.mxu0 %v1086_v0  ;;  %924 = vmatprep.mubr.msk.f32.mxu0 %vm1087_vm0, %v1086_v0  ;;  %v194_v3 = vld [vmem:[%s1268_s1] sm:$0xff]  ;;  %v878_v4 = vld [vmem:[%s1186_s28 + $0x18] sm:$0xff]  ;;  %v196_v5 = vld [vmem:[%s1269_s2 + $0x8] sm:$0xff]  ;;  %s873_s6 = sshll.u32 %s863_s16, 2  ;;  %vm347_vm2 = vcmask 64512  }
  0x31   : > { %927 = vmatprep.subr.mxu1 %v1086_v0  ;;  %931 = vmatprep.mubr.msk.f32.mxu1 %vm1087_vm0, %v1086_v0  ;;  %v877_v6 = vld [vmem:[%s1186_s28 + $0x10] sm:$0xff]  ;;  %v883_v7 = vld [vmem:[%s1186_s28 + $0x28] sm:$0xff]  ;;  %v882_v8 = vld [vmem:[%s1186_s28 + $0x20] sm:$0xff]  ;;  %p189_p8 = scmp.lt.s32.totalorder %s873_s6, 7 }
  0x32   : > { %921 = vmatpush3.msra.mxu0 %v198_v1  ;;  %928 = vmatpush3.msra.mxu1 %v196_v5  ;;  %v888_v9 = vld [vmem:[%s1186_s28 + $0x38] sm:$0xff]  ;;  %v887_v10 = vld [vmem:[%s1186_s28 + $0x30] sm:$0xff]  ;;  %v195_v11 = vld [vmem:[%s1269_s2] sm:$0xff] }
  0x33   : > { %922 = vmatprep.subr.mxu0 %v1086_v0  ;;  %929 = vmatprep.subr.mxu1 %v1086_v0  ;;  %s1281_s6 = smov (!%p189_p8, %s873_s6), 7 }
  0x34   : > { %923 = vmatpush3.msra.mxu0 %v197_v2  ;;  %930 = vmatpush3.msra.mxu1 %v195_v11  ;;  %s874_s7 = sshll.u32 %s1281_s6, 3 }
  0x35   : > { %925 = vmatmul.mubr.msk.f32.vlgmr.msra.gmra.mxu0 %vm199_vm1, %v194_v3  ;;  %934 = vmatprep.subr.mxu0 %v1086_v0  ;;  %s192_s10 = scalar_lea.vmem %s1270_s3, %s874_s7 }
  0x36   : > { %935 = vmatpush3.msra.mxu0 %v878_v4  ;;  %938 = vmatprep.mubr.msk.f32.mxu0 %vm1087_vm0, %v1086_v0 }
  0x37   : > { %936 = vmatprep.subr.mxu0 %v1086_v0  ;;  %941 = vmatprep.subr.mxu1 %v1086_v0 }
  0x38   : > { %937 = vmatpush3.msra.mxu0 %v877_v6 }
  0x39   : > { %939 = vmatmul.mubr.msk.f32.vlgmr.msra.gmra.mxu0 %vm199_vm1, %v194_v3  ;;  %948 = vmatprep.subr.mxu0 %v1086_v0 }
  0x3a   : > { %949 = vmatpush3.msra.mxu0 %v883_v7  ;;  %952 = vmatprep.mubr.msk.f32.mxu0 %vm1087_vm0, %v1086_v0 }
  0x3b   : > { %950 = vmatprep.subr.mxu0 %v1086_v0 }
  0x3c   : > { %951 = vmatpush3.msra.mxu0 %v882_v8 }
  0x3d   : > { %953 = vmatmul.mubr.msk.f32.vlgmr.msra.gmra.mxu0 %vm199_vm1, %v194_v3  ;;  %962 = vmatprep.subr.mxu0 %v1086_v0 }
  0x3e   : > { %963 = vmatpush3.msra.mxu0 %v888_v9  ;;  %966 = vmatprep.mubr.msk.f32.mxu0 %vm1087_vm0, %v1086_v0 }
  0x3f   : > { %964 = vmatprep.subr.mxu0 %v1086_v0 }
  0x40   : > { %965 = vmatpush3.msra.mxu0 %v887_v10 }
  0x41   : > { %967 = vmatmul.mubr.msk.f32.vlgmr.msra.gmra.mxu0 %vm199_vm1, %v194_v3 }
  0xf5   : > { %v269_v12 = vpop.f32.mrf.mxu0 }
  0xf6   : > { %932 = vmatmul.mubr.msk.f32.vlgmr.msra.gmra.mxu1 %vm199_vm1, %v269_v12 }
  0xf7   : > { %v926_v13 = vpop.f32.mrf.mxu0  ;;  %942 = vmatpush3.msra.mxu1 %v196_v5  ;;  %945 = vmatprep.mubr.msk.f32.mxu1 %vm1087_vm0, %v1086_v0 }
  0xf8   : > { %943 = vmatprep.subr.mxu1 %v1086_v0 }
  0xf9   : > { %v418_v14 = vpop.f32.mrf.mxu0  ;;  %944 = vmatpush3.msra.mxu1 %v195_v11 }
  0xfa   : > { %946 = vmatmul.mubr.msk.f32.vlgmr.msra.gmra.mxu1 %vm199_vm1, %v418_v14  ;;  %955 = vmatprep.subr.mxu1 %v1086_v0 }
  0xfb   : > { %v940_v15 = vpop.f32.mrf.mxu0  ;;  %956 = vmatpush3.msra.mxu1 %v196_v5  ;;  %959 = vmatprep.mubr.msk.f32.mxu1 %vm1087_vm0, %v1086_v0 }
  0xfc   : > { %957 = vmatprep.subr.mxu1 %v1086_v0 }
  0xfd   : > { %v567_v16 = vpop.f32.mrf.mxu0  ;;  %958 = vmatpush3.msra.mxu1 %v195_v11 }
  0xfe   : > { %960 = vmatmul.mubr.msk.f32.vlgmr.msra.gmra.mxu1 %vm199_vm1, %v567_v16  ;;  %969 = vmatprep.subr.mxu1 %v1086_v0 }
  0xff   : > { %v954_v17 = vpop.f32.mrf.mxu0  ;;  %970 = vmatpush3.msra.mxu1 %v196_v5  ;;  %973 = vmatprep.mubr.msk.f32.mxu1 %vm1087_vm0, %v1086_v0 }
 0x100   : > { %971 = vmatprep.subr.mxu1 %v1086_v0 }
 0x101   : > { %v716_v18 = vpop.f32.mrf.mxu0  ;;  %972 = vmatpush3.msra.mxu1 %v195_v11 }
 0x102   : > { %974 = vmatmul.mubr.msk.f32.vlgmr.msra.gmra.mxu1 %vm199_vm1, %v716_v18 }
 0x103   : > { %v968_v19 = vpop.f32.mrf.mxu0 }
 0x1b6   : > { %v342_v20 = vpop.f32.mrf.mxu1 }
 0x1b7   : > { %v346_v21 = vmul.f32 0.11111111, %v342_v20 }
 0x1b8   : > { %v933_v22 = vpop.f32.mrf.mxu1 }
 0x1b9   : > { %348 = vst.msk [vmem:[%s192_s10] sm:$0xff] %vm347_vm2, %v346_v21 }
 0x1ba   : > { %v491_v23 = vpop.f32.mrf.mxu1 }
 0x1bb   : > { %v495_v24 = vmul.f32 0.11111111, %v491_v23 }
 0x1bc   : > { %v947_v25 = vpop.f32.mrf.mxu1 }
 0x1bd   : > { %881 = vst.msk [vmem:[%s192_s10 + $0x8] sm:$0xff] %vm347_vm2, %v495_v24 }
 0x1be   : > { %v640_v26 = vpop.f32.mrf.mxu1 }
 0x1bf   : > { %v644_v27 = vmul.f32 0.11111111, %v640_v26 }
 0x1c0   : > { %v961_v28 = vpop.f32.mrf.mxu1 }
 0x1c1   : > { %886 = vst.msk [vmem:[%s192_s10 + $0x10] sm:$0xff] %vm347_vm2, %v644_v27 }
 0x1c2   : > { %v789_v29 = vpop.f32.mrf.mxu1 }
 0x1c3   : > { %v793_v30 = vmul.f32 0.11111111, %v789_v29 }
 0x1c4   : > { %v975_v31 = vpop.f32.mrf.mxu1 }
 0x1c5   : > { %891 = vst.msk [vmem:[%s192_s10 + $0x18] sm:$0xff] %vm347_vm2, %v793_v30 }
 0x1c6 PF: > { %p13_p9 = scmp.ge.s32.totalorder %s1128_s17, 4   ;;  %s1276_s12 = smov %s1073_s13 }
 0x1c7   : > { %s1277_s13 = smov %s1077_s14  ;;  %s1278_s14 = smov %s1138_s20 }
 0x1c8   : > { %s1279_s15 = smov %s1128_s17  ;;  %15 = sbr.rel (!%p13_p9) target bundleno = 3 (0x3), region = 78 }
 0x1cd   :  { %818 = vsyncpa [#allocation3], 1 }
 0x1ce   :  { %820 = vsyncpa [#allocation3 + $0x1], 1 }

// kernel: _lambda_.3
= control target key start
LH: loop header
LB: loop body
LE: loop exit
PB: predicated region body
PF: predicated region fallthrough
CT: control target
= control target key end

     0   :  { %8 = vsyncpa [#allocation3], 0  ;;  %s1185_s0 = inlined_call_operand.vmem [shape: f32[8,8,8], index: 0, kind: input, shape index: {}]   ;;  %s1186_s1 = inlined_call_operand.vmem [shape: f32[4,8], index: 1, kind: input, shape index: {}]   ;;  %s1187_s2 = inlined_call_operand.vmem [shape: f32[8,4], index: 2, kind: input, shape index: {}]   ;;  %s1188_s3 = inlined_call_operand.hbm [shape: f32[8,4,4], index: 3, kind: output, shape index: {}]  }
   0x1   :  { %10 = vsyncpa [#allocation3 + $0x1], 0  ;;  %s1058_s12 = smov 0   ;;  %s1060_s13 = smov 0  }
   0x2   :  { %s1062_s14 = smov 0   ;;  %s1064_s15 = smov 0  }
   0x3 LB: > { %s1079_s16 = sadd.s32 4294967295, %s1031_s15   ;;  %s845_s17 = sadd.s32 4294967294, %s1031_s15   ;;  %s1031_s15 = sphi %s1064_s15, %s1194_s15   ;;  %s1027_s14 = sphi %s1062_s14, %s1193_s14   ;;  %s1023_s13 = sphi %s1060_s13, %s1192_s13   ;;  %s1019_s12 = sphi %s1058_s12, %s1191_s12  }
   0x4   : > { %s1083_s18 = sadd.s32 1, %s1031_s15   ;;  %s91_s19 = sadd.s32 1, %s1027_s14 }
   0x5   : > { %s88_s20 = ssub.s32 %s1031_s15, %s1083_s18  ;;  %p101_p0 = scmp.ne.s32.totalorder %s1027_s14, %s1023_s13 }
   0x6   : > { %p89_p1 = scmp.eq.s32.totalorder %s88_s20, 0  ;;  %p102_p2 = scmp.eq.s32.totalorder %s1079_s16, 1 }
   0x7   : > { %p107_p3 = scmp.ne.s32.totalorder %s1023_s13, %s1019_s12  ;;  %p108_p4 = scmp.eq.s32.totalorder %s845_s17, 1 }
   0x8   : > { %s1094_s21 = scalar_select %p89_p1, %s1027_s14, %s91_s19  }
   0x9   : > { %p1096_p5 = por %p102_p2, %p101_p0  ;;  %p1100_p6 = por %p108_p4, %p107_p3 }
   0xa   : > { %p848_p7 = scmp.ge.s32.totalorder %s1031_s15, 1  ;;  %p141_p8 = scmp.lt.s32.totalorder %s1031_s15, 3 }
   0xc   : > { %p142_p9 = pnand %p848_p7, %p141_p8 }
   0xd   : > { %s850_s24 = sshll.u32 (!%p142_p9), %s1079_s16, 2  ;;  %s162_s6 = sand.u32 (!%p142_p9), 1, %s1023_s13  }
   0xe   : > { %145 = sbr.rel (%p142_p9) target bundleno = 438 (0x1b6), region = 32  ;;  %p166_p10 = scmp.lt.s32.totalorder (!%p142_p9), %s850_s24, 7 }
   0xf   : > { %s849_s7 = sshll.u32 (!%p142_p9), %s162_s6, 4  ;;  %s871_s10 = sshll.u32 (!%p142_p9), %s1079_s16, 8 }
  0x10   : > { %s164_s8 = scalar_lea.vmem (!%p142_p9), [#allocation2], %s849_s7  ;;  %s1142_s19 = scalar_lea.hbm (!%p142_p9), %s1188_s3, %s871_s10 }
  0x11   : > { %s783_s9 = sshll.u32 (!%p142_p9), %s164_s8, 4  ;;  %s1145_s20 = scalar_lea.sflag (!%p142_p9), [#allocation3], %s162_s6  ;;  %s1137_s9 = int_to_ptr.vmem [resolvable:$true] %s783_s9 }
  0x12   : > { %s971_s16 = scalar_lea.vmem (!%p142_p9), %s1137_s9, 256 }
  0x13   : > { %v1033_v0 = vmov 0.0   ;;  %vm1034_vm0 = vmmov 0   ;;  %s1196_s24 = smov (!%p166_p10, %s850_s24), 7  ;;  %v172_v1 = vld [vmem:[%s1186_s1] sm:$0xf]  ;;  %vm175_vm1 = vcmask 64512   ;;  %p972_p11 = scmp.ne.s32.totalorder %s1137_s9, %s971_s16 }
  0x14   : > { %888 = vmatprep.subr.mxu0 %v1033_v0  ;;  %890 = vmatprep.mubr.msk.f32.mxu0 %vm1034_vm0, %v1033_v0  ;;  %s851_s25 = sshll.u32 %s1196_s24, 3  ;;  %v173_v6 = vld [vmem:[%s1187_s2] sm:$0xff]  ;;  %vm323_vm2 = vcmask 27648   ;;  %s1035_s24 = smov [#allocation2]  }
  0x15   : > { %893 = vmatprep.subr.mxu1 %v1033_v0  ;;  %895 = vmatprep.mubr.msk.f32.mxu1 %vm1034_vm0, %v1033_v0  ;;  %s169_s28 = scalar_lea.vmem %s1185_s0, %s851_s25  ;;  %p973_p12 = pnand %p972_p11, %p1096_p5 }
  0x16   : > { %v174_v2 = vld [vmem:[%s169_s28] sm:$0xff]  ;;  %v854_v3 = vld [vmem:[%s169_s28 + $0x8] sm:$0xff]  ;;  %v858_v4 = vld [vmem:[%s169_s28 + $0x10] sm:$0xff]  ;;  %894 = vmatpush3.msra.mxu1 %v173_v6  ;;  %s975_s25 = sshll.u32 %s1035_s24, 4  ;;  %s976_s25 = int_to_ptr.vmem [resolvable:$false] %s975_s25 }
  0x17   : > { %889 = vmatpush3.msra.mxu0 %v174_v2  ;;  %v862_v5 = vld [vmem:[%s169_s28 + $0x18] sm:$0xff]  ;;  %903 = vmatprep.subr.mxu1 %v1033_v0  ;;  %p974_p13 = pneg %p973_p12  ;;  %s977_s26 = scalar_lea.vmem %s976_s25, 512 }
  0x18   : > { %891 = vmatmul.mubr.msk.f32.vlgmr.msra.gmra.mxu0 %vm175_vm1, %v172_v1  ;;  %898 = vmatprep.subr.mxu0 %v1033_v0  ;;  %p978_p0 = scmp.lt.s32.totalorder %s1137_s9, %s976_s25  ;;  %p979_p1 = scmp.lt.s32.totalorder %s977_s26, %s971_s16 }
  0x19   : > { %899 = vmatpush3.msra.mxu0 %v854_v3  ;;  %900 = vmatprep.mubr.msk.f32.mxu0 %vm1034_vm0, %v1033_v0 }
  0x1a   : > { %908 = vmatprep.subr.mxu0 %v1033_v0  ;;  %p980_p2 = por %p979_p1, %p978_p0 }
  0x1c   : > { %901 = vmatmul.mubr.msk.f32.vlgmr.msra.gmra.mxu0 %vm175_vm1, %v172_v1  ;;  %p981_p3 = pnand %p980_p2, %p974_p13 }
  0x1d   : > { %909 = vmatpush3.msra.mxu0 %v858_v4  ;;  %910 = vmatprep.mubr.msk.f32.mxu0 %vm1034_vm0, %v1033_v0 }
  0x1e   : > { %918 = vmatprep.subr.mxu0 %v1033_v0 }
  0x20   : > { %911 = vmatmul.mubr.msk.f32.vlgmr.msra.gmra.mxu0 %vm175_vm1, %v172_v1 }
  0x21   : > { %919 = vmatpush3.msra.mxu0 %v862_v5  ;;  %920 = vmatprep.mubr.msk.f32.mxu0 %vm1034_vm0, %v1033_v0 }
  0x24   : > { %921 = vmatmul.mubr.msk.f32.vlgmr.msra.gmra.mxu0 %vm175_vm1, %v172_v1 }
  0xd8   : > { %v245_v7 = vpop.f32.mrf.mxu0 }
  0xd9   : > { %896 = vmatmul.mubr.msk.f32.vlgmr.msra.gmra.mxu1 %vm175_vm1, %v245_v7 }
  0xda   : > { %v892_v8 = vpop.f32.mrf.mxu0  ;;  %904 = vmatpush3.msra.mxu1 %v173_v6  ;;  %905 = vmatprep.mubr.msk.f32.mxu1 %vm1034_vm0, %v1033_v0 }
  0xdb   : > { %913 = vmatprep.subr.mxu1 %v1033_v0 }
  0xdc   : > { %v393_v9 = vpop.f32.mrf.mxu0 }
  0xdd   : > { %906 = vmatmul.mubr.msk.f32.vlgmr.msra.gmra.mxu1 %vm175_vm1, %v393_v9 }
  0xde   : > { %v902_v10 = vpop.f32.mrf.mxu0  ;;  %914 = vmatpush3.msra.mxu1 %v173_v6  ;;  %915 = vmatprep.mubr.msk.f32.mxu1 %vm1034_vm0, %v1033_v0 }
  0xdf   : > { %923 = vmatprep.subr.mxu1 %v1033_v0 }
  0xe0   : > { %v541_v11 = vpop.f32.mrf.mxu0 }
  0xe1   : > { %916 = vmatmul.mubr.msk.f32.vlgmr.msra.gmra.mxu1 %vm175_vm1, %v541_v11 }
  0xe2   : > { %v912_v12 = vpop.f32.mrf.mxu0  ;;  %924 = vmatpush3.msra.mxu1 %v173_v6  ;;  %925 = vmatprep.mubr.msk.f32.mxu1 %vm1034_vm0, %v1033_v0 }
  0xe4   : > { %v689_v13 = vpop.f32.mrf.mxu0 }
  0xe5   : > { %926 = vmatmul.mubr.msk.f32.vlgmr.msra.gmra.mxu1 %vm175_vm1, %v689_v13 }
  0xe6   : > { %v922_v14 = vpop.f32.mrf.mxu0 }
 0x199   : > { %v318_v15 = vpop.f32.mrf.mxu1 }
 0x19a   : > { %v322_v16 = vmul.f32 0.11111111, %v318_v15 }
 0x19b   : > { %v897_v17 = vpop.f32.mrf.mxu1 }
 0x19c   : > { %324 = vst.msk [vmem:[%s164_s8] sm:$0xf] %vm323_vm2, %v322_v16 }
 0x19d   : > { %v466_v18 = vpop.f32.mrf.mxu1 }
 0x19e   : > { %v470_v19 = vmul.f32 0.11111111, %v466_v18 }
 0x19f   : > { %v907_v20 = vpop.f32.mrf.mxu1 }
 0x1a0   : > { %857 = vst.msk [vmem:[%s164_s8 + $0x4] sm:$0xf] %vm323_vm2, %v470_v19 }
 0x1a1   : > { %v614_v21 = vpop.f32.mrf.mxu1 }
 0x1a2   : > { %v618_v22 = vmul.f32 0.11111111, %v614_v21 }
 0x1a3   : > { %v917_v23 = vpop.f32.mrf.mxu1 }
 0x1a4   : > { %861 = vst.msk [vmem:[%s164_s8 + $0x8] sm:$0xf] %vm323_vm2, %v618_v22 }
 0x1a5   : > { %v762_v24 = vpop.f32.mrf.mxu1 }
 0x1a6   : > { %v766_v25 = vmul.f32 0.11111111, %v762_v24 }
 0x1a7   : > { %v927_v26 = vpop.f32.mrf.mxu1 }
 0x1a8   : > { %865 = vst.msk [vmem:[%s164_s8 + $0xc] sm:$0xf] %vm323_vm2, %v766_v25 }
 0x1a9   : > { %984 = shalt.err (!%p981_p3)
}
 0x1aa   : > { %s985_s27 = scalar_lea.hbm %s1142_s19, 256  ;;  %s989_s30 = scalar_lea.hbm %s1188_s3, 512 }
 0x1ab   : > { %p986_p4 = scmp.ne.s32.totalorder %s1142_s19, %s985_s27  ;;  %p990_p9 = scmp.lt.s32.totalorder %s1142_s19, %s1188_s3 }
 0x1ac   : > { %p991_p10 = scmp.lt.s32.totalorder %s989_s30, %s985_s27 }
 0x1ad   : > { %p987_p7 = pnand %p986_p4, %p1096_p5 }
 0x1ae   : > { %p992_p11 = por %p991_p10, %p990_p9 }
 0x1af   : > { %p988_p8 = pneg %p987_p7 }
 0x1b1   : > { %p993_p12 = pnand %p992_p11, %p988_p8 }
 0x1b3   : > { %996 = shalt.err (!%p993_p12)
}
 0x1b4   : > { %s1036_s6 = smov 64   ;;  %s1037_s7 = smov 4  }
 0x1b5   : > { %928 = dma.vmem_to_hbm [thread:$0]  (%p1096_p5), %s1137_s9, 256, %s1142_s19, %s1145_s20, %s1036_s6, %s1036_s6, %s1037_s7  }
 0x1b6 PF: > { %p934_p13 = scmp.ge.s32.totalorder %s1031_s15, 2  ;;  %s798_s8 = sand.u32 1, %s1019_s12  }
 0x1b7   : > { %s799_s10 = scalar_lea.sflag [#allocation3], %s798_s8 }
 0x1b8   : > { %p931_p0 = pnand %p934_p13, %p1100_p6 }
 0x1ba   : > { %p932_p1 = pneg %p931_p0 }
 0x1bc   : > { %1014 = dma.done.wait (%p932_p1), %s799_s10, 256  }
 0x1bd   : > { %1016 = vsyncadd (%p932_p1), %s799_s10, 4294967040  ;;  %p13_p2 = scmp.ge.s32.totalorder %s1083_s18, 4   ;;  %s1191_s12 = smov %s1023_s13 }
 0x1be   : > { %s1192_s13 = smov %s1027_s14  ;;  %s1193_s14 = smov %s1094_s21 }
 0x1bf   : > { %s1194_s15 = smov %s1083_s18  ;;  %15 = sbr.rel (!%p13_p2) target bundleno = 3 (0x3), region = 73 }
 0x1c4   :  { %804 = vsyncpa [#allocation3], 1 }
 0x1c5   :  { %806 = vsyncpa [#allocation3 + $0x1], 1 }

</bundles_post_ra>
